<compile_context>
chip_gen: v5e
topology: v5e:2x2
jax: 0.10.0
libtpu: 0.0.40
codegen_flags: <defaults>
</compile_context>

<pallas_src>
import jax
import jax.numpy as jnp
from jax import lax
from jax.experimental import pallas as pl
from jax.experimental.pallas import tpu as pltpu


_VMEM_BUDGET_BYTES = 48 * 1024 * 1024  # safe on v5e/v6e (128 MiB) and v7x (64 MiB)


def _round_up(x, m):
    return ((x + m - 1) // m) * m


def _vmem_bytes_estimate(tm, in_dim, hid, out_dim, x_bytes):
    """Rough VMEM footprint for one grid step, including lane padding."""
    pad = lambda d: _round_up(max(d, 1), 128)
    x_blk = 2 * tm * pad(in_dim) * x_bytes          # double-buffered x tiles
    h_tmp = 3 * tm * pad(hid) * 4                   # h1/h2/acc f32 intermediates
    if out_dim == 1:
        o_blk = 2 * 8 * _round_up(tm, 128) * 4      # (1, tm) block, sublane-padded
    else:
        o_blk = 2 * tm * pad(out_dim) * 4
    weights = (pad(in_dim) * hid + hid * hid + 8 * hid + 4 * pad(hid)) * 4 * 2
    return x_blk + h_tmp + o_blk + weights + (1 << 20)   # +1 MiB slack


def _make_mlp_kernel(lane_dense_out):
    """Fused 3-layer MLP kernel body.

    When lane_dense_out, w3_ref is an (8, hid) row-replicated copy of the
    (hid, 1) fc3 weight; the fc3 reduction is computed lane-major as
    (8, tm) = w3 @ h2^T and row 0 is stored into the (1, tm) output block,
    so stores are dense along lanes.
    """

    def kernel(x_ref, w1_ref, b1_ref, w2_ref, b2_ref, w3_ref, b3_ref, o_ref):
        mm_dtype = x_ref.dtype
        # fc1 + ReLU (bias add / ReLU in f32 on the VPU)
        h1 = jnp.dot(x_ref[...], w1_ref[...], preferred_element_type=jnp.float32)
        h1 = jnp.maximum(h1 + b1_ref[...], 0.0)
        # fc2 + ReLU
        h2 = jnp.dot(h1.astype(mm_dtype), w2_ref[...],
                     preferred_element_type=jnp.float32)
        h2 = jnp.maximum(h2 + b2_ref[...], 0.0)
        # fc3
        if lane_dense_out:
            # (8, hid) x (tm, hid) contracted on hid -> (8, tm); rows identical.
            res = lax.dot_general(
                w3_ref[...], h2.astype(mm_dtype),
                dimension_numbers=(((1,), (1,)), ((), ())),
                preferred_element_type=jnp.float32)
            o_ref[...] = (res[0:1, :] + b3_ref[...]).astype(o_ref.dtype)
        else:
            out = jnp.dot(h2.astype(mm_dtype), w3_ref[...],
                          preferred_element_type=jnp.float32)
            o_ref[...] = (out + b3_ref[...]).astype(o_ref.dtype)

    return kernel


def relu_regression_forward(x, params, *, tile_m=8192,
                            matmul_dtype=jnp.float32, vmem_limit_bytes=None):
    """Fused forward pass.  x: [B, input_dim] float32.

    matmul_dtype=jnp.bfloat16 halves the x/weight HBM traffic (recommended on
    v6e/v7x when reduced-precision matmul inputs are acceptable); bias add,
    ReLU and matmul accumulation remain f32.  Note bf16 will NOT meet a
    1e-5 tolerance vs. an f32/f64 reference.
    """
    w1, b1, w2, b2, w3, b3 = params
    B, in_dim = x.shape
    hid = w1.shape[1]
    out_dim = w3.shape[1]
    lane_dense = (out_dim == 1)

    if vmem_limit_bytes is None:
        vmem_limit_bytes = _VMEM_BUDGET_BYTES
    x_bytes = jnp.dtype(matmul_dtype).itemsize

    # --- batch tiling -------------------------------------------------------
    padded_b0 = _round_up(B, 8)
    tm = min(_round_up(tile_m, 8), padded_b0)
    # Clamp the tile so the estimated VMEM footprint (with lane padding and
    # double buffering) fits the budget on every TPU generation.
    while tm > 8 and _vmem_bytes_estimate(tm, in_dim, hid, out_dim,
                                          x_bytes) > vmem_limit_bytes:
        tm = max(8, _round_up(tm // 2, 8))
    grid_m = pl.cdiv(padded_b0, tm)
    padded_b = grid_m * tm
    if padded_b != B:
        # Pad with zeros; padded rows compute finite garbage and are sliced off.
        x = jnp.pad(x, ((0, padded_b - B), (0, 0)))

    # Wrapper-side casts so the x DMA streams matmul_dtype bytes from HBM.
    x = x.astype(matmul_dtype)
    w1c = w1.astype(matmul_dtype)
    w2c = w2.astype(matmul_dtype)

    # fc3 weight: (8, hid) row-replicated when out_dim == 1 (lane-dense path;
    # 8 rows keep the MXU operand sublane-aligned and the result is sliced).
    if lane_dense:
        w3_arg = jnp.tile(jnp.reshape(w3, (1, hid)), (8, 1)).astype(matmul_dtype)
        w3_spec = pl.BlockSpec((8, hid), lambda i: (0, 0))
    else:
        w3_arg = w3.astype(matmul_dtype)
        w3_spec = pl.BlockSpec((hid, out_dim), lambda i: (0, 0))

    # Weights/biases use constant index_maps, so they stay VMEM-resident across
    # all grid steps while only the x/out tiles stream.
    in_specs = [
        pl.BlockSpec((tm, in_dim), lambda i: (i, 0)),       # x tile (streams)
        pl.BlockSpec((in_dim, hid), lambda i: (0, 0)),      # w1
        pl.BlockSpec((1, hid), lambda i: (0, 0)),           # b1
        pl.BlockSpec((hid, hid), lambda i: (0, 0)),         # w2
        pl.BlockSpec((1, hid), lambda i: (0, 0)),           # b2
        w3_spec,                                            # w3
        pl.BlockSpec((1, out_dim), lambda i: (0, 0)),       # b3
    ]

    if lane_dense:
        # Lane-dense output slab: one (1, tm) row per grid step.
        out_shape = jax.ShapeDtypeStruct((grid_m, tm), jnp.float32)
        out_specs = pl.BlockSpec((1, tm), lambda i: (i, 0))
    else:
        out_shape = jax.ShapeDtypeStruct((padded_b, out_dim), jnp.float32)
        out_specs = pl.BlockSpec((tm, out_dim), lambda i: (i, 0))

    out = pl.pallas_call(
        _make_mlp_kernel(lane_dense),
        out_shape=out_shape,
        grid=(grid_m,),
        in_specs=in_specs,
        out_specs=out_specs,
        compiler_params=pltpu.CompilerParams(
            dimension_semantics=("parallel",),
            vmem_limit_bytes=vmem_limit_bytes,
        ),
    )(x, w1c, b1, w2c, b2, w3_arg, b3)

    if lane_dense:
        return out.reshape(-1)[:B].reshape(B, 1)
    return out[:B] if padded_b != B else out


def init_params(key, input_dim, hidden_dim=64, output_dim=1):
    """Deterministic init mimicking nn.Linear's U(-1/sqrt(fan_in), 1/sqrt(fan_in))."""
    ks = jax.random.split(key, 6)

    def lin(kw, kb, fan_in, fan_out):
        bound = 1.0 / jnp.sqrt(fan_in)
        w = jax.random.uniform(kw, (fan_in, fan_out), jnp.float32, -bound, bound)
        b = jax.random.uniform(kb, (1, fan_out), jnp.float32, -bound, bound)
        return w, b

    w1, b1 = lin(ks[0], ks[1], input_dim, hidden_dim)
    w2, b2 = lin(ks[2], ks[3], hidden_dim, hidden_dim)
    w3, b3 = lin(ks[4], ks[5], hidden_dim, output_dim)
    return (w1, b1, w2, b2, w3, b3)


if __name__ == "__main__":
    key = jax.random.PRNGKey(0)
    k_x, k_p, k_x2 = jax.random.split(key, 3)

    batch, input_dim, hidden_dim, output_dim = 16, 16, 64, 1
    x = jax.random.normal(k_x, (batch, input_dim), dtype=jnp.float32)
    params = init_params(k_p, input_dim, hidden_dim, output_dim)
    w1, b1, w2, b2, w3, b3 = params

    def ref_fwd(xi):
        h = jnp.maximum(xi @ w1 + b1, 0.0)
        h = jnp.maximum(h @ w2 + b2, 0.0)
        return h @ w3 + b3

    # Small batch, single grid step.
    out = jax.block_until_ready(relu_regression_forward(x, params))
    assert out.shape == (batch, output_dim)
    assert jnp.allclose(out, ref_fwd(x), atol=1e-5, rtol=1e-5)

    # Multi-grid-step + padding path (batch not a multiple of the tile).
    x2 = jax.random.normal(k_x2, (300, input_dim), dtype=jnp.float32)
    out2 = jax.block_until_ready(relu_regression_forward(x2, params, tile_m=128))
    assert out2.shape == (300, output_dim)
    assert jnp.allclose(out2, ref_fwd(x2), atol=1e-5, rtol=1e-5)

    # bf16-streaming path (reduced-precision matmul inputs, looser tolerance).
    out_bf = jax.block_until_ready(
        relu_regression_forward(x2, params, tile_m=128,
                                matmul_dtype=jnp.bfloat16))
    assert out_bf.shape == (300, output_dim)
    assert jnp.allclose(out_bf, ref_fwd(x2), atol=5e-2, rtol=5e-2)

    print("KERNEL_OK")
</pallas_src>

<mosaic_0001>
module attributes {stable_mosaic.version = 11 : i64} {
  func.func @kernel(%arg0: i32, %arg1: memref<16x16xf32, #tpu.memory_space<vmem>>, %arg2: memref<16x64xf32, #tpu.memory_space<vmem>>, %arg3: memref<1x64xf32, #tpu.memory_space<vmem>>, %arg4: memref<64x64xf32, #tpu.memory_space<vmem>>, %arg5: memref<1x64xf32, #tpu.memory_space<vmem>>, %arg6: memref<8x64xf32, #tpu.memory_space<vmem>>, %arg7: memref<1x1xf32, #tpu.memory_space<vmem>>, %arg8: memref<1x16xf32, #tpu.memory_space<vmem>>) attributes {dimension_semantics = [#tpu.dimension_semantics<parallel>], iteration_bounds = array<i64: 1>, scalar_prefetch = 0 : i64, scratch_operands = 0 : i64, tpu.core_type = #tpu.core_type<tc>, window_params = [{transform_indices = @transform_0, window_bounds = array<i64: 16, 16>}, {pipeline_mode = #tpu.pipeline_mode<synchronous>, transform_indices = @transform_1, window_bounds = array<i64: 16, 64>}, {pipeline_mode = #tpu.pipeline_mode<synchronous>, transform_indices = @transform_2, window_bounds = array<i64: 1, 64>}, {pipeline_mode = #tpu.pipeline_mode<synchronous>, transform_indices = @transform_3, window_bounds = array<i64: 64, 64>}, {pipeline_mode = #tpu.pipeline_mode<synchronous>, transform_indices = @transform_4, window_bounds = array<i64: 1, 64>}, {pipeline_mode = #tpu.pipeline_mode<synchronous>, transform_indices = @transform_5, window_bounds = array<i64: 8, 64>}, {pipeline_mode = #tpu.pipeline_mode<synchronous>, transform_indices = @transform_6, window_bounds = array<i64: 1, 1>}, {transform_indices = @transform_7, window_bounds = array<i64: 1, 16>}]} {
    %c0 = arith.constant 0 : index
    %c0_0 = arith.constant 0 : index
    %0 = vector.load %arg1[%c0, %c0_0] : memref<16x16xf32, #tpu.memory_space<vmem>>, vector<16x16xf32>
    %c0_1 = arith.constant 0 : index
    %c0_2 = arith.constant 0 : index
    %1 = vector.load %arg2[%c0_1, %c0_2] : memref<16x64xf32, #tpu.memory_space<vmem>>, vector<16x64xf32>
    %cst = arith.constant dense<0.000000e+00> : vector<16x64xf32>
    %2 = tpu.matmul %0, %1, %cst {dimension_numbers = #tpu.dot_dimension_numbers<[1], [0], [0], [1], [0, 0, 1, 1], [], []>} : vector<16x16xf32>, vector<16x64xf32>, vector<16x64xf32> -> vector<16x64xf32>
    %c0_3 = arith.constant 0 : index
    %c0_4 = arith.constant 0 : index
    %3 = vector.load %arg3[%c0_3, %c0_4] : memref<1x64xf32, #tpu.memory_space<vmem>>, vector<1x64xf32>
    %4 = vector.broadcast %3 : vector<1x64xf32> to vector<16x64xf32>
    %5 = arith.addf %2, %4 : vector<16x64xf32>
    %cst_5 = arith.constant 0.000000e+00 : f32
    %6 = vector.broadcast %cst_5 : f32 to vector<16x64xf32>
    %7 = arith.maximumf %5, %6 : vector<16x64xf32>
    %c0_6 = arith.constant 0 : index
    %c0_7 = arith.constant 0 : index
    %8 = vector.load %arg4[%c0_6, %c0_7] : memref<64x64xf32, #tpu.memory_space<vmem>>, vector<64x64xf32>
    %cst_8 = arith.constant dense<0.000000e+00> : vector<16x64xf32>
    %9 = tpu.matmul %7, %8, %cst_8 {dimension_numbers = #tpu.dot_dimension_numbers<[1], [0], [0], [1], [0, 0, 1, 1], [], []>} : vector<16x64xf32>, vector<64x64xf32>, vector<16x64xf32> -> vector<16x64xf32>
    %c0_9 = arith.constant 0 : index
    %c0_10 = arith.constant 0 : index
    %10 = vector.load %arg5[%c0_9, %c0_10] : memref<1x64xf32, #tpu.memory_space<vmem>>, vector<1x64xf32>
    %11 = vector.broadcast %10 : vector<1x64xf32> to vector<16x64xf32>
    %12 = arith.addf %9, %11 : vector<16x64xf32>
    %cst_11 = arith.constant 0.000000e+00 : f32
    %13 = vector.broadcast %cst_11 : f32 to vector<16x64xf32>
    %14 = arith.maximumf %12, %13 : vector<16x64xf32>
    %c0_12 = arith.constant 0 : index
    %c0_13 = arith.constant 0 : index
    %15 = vector.load %arg6[%c0_12, %c0_13] : memref<8x64xf32, #tpu.memory_space<vmem>>, vector<8x64xf32>
    %cst_14 = arith.constant dense<0.000000e+00> : vector<8x16xf32>
    %16 = tpu.matmul %15, %14, %cst_14 {dimension_numbers = #tpu.dot_dimension_numbers<[1], [1], [0], [0], [0, 0, 1, 0], [], []>} : vector<8x64xf32>, vector<16x64xf32>, vector<8x16xf32> -> vector<8x16xf32>
    %17 = vector.extract_strided_slice %16 {offsets = [0, 0], sizes = [1, 16], strides = [1, 1]} : vector<8x16xf32> to vector<1x16xf32>
    %c0_15 = arith.constant 0 : index
    %c0_16 = arith.constant 0 : index
    %18 = vector.load %arg7[%c0_15, %c0_16] : memref<1x1xf32, #tpu.memory_space<vmem>>, vector<1x1xf32>
    %19 = vector.broadcast %18 : vector<1x1xf32> to vector<1x16xf32>
    %20 = arith.addf %17, %19 : vector<1x16xf32>
    %c0_17 = arith.constant 0 : index
    %c0_18 = arith.constant 0 : index
    %21 = vector.load %arg8[%c0_17, %c0_18] : memref<1x16xf32, #tpu.memory_space<vmem>>, vector<1x16xf32>
    tpu.vector_store %arg8[%c0_17, %c0_18], %20 {strides = array<i32>} : memref<1x16xf32, #tpu.memory_space<vmem>>, vector<1x16xf32>,
    return
  }
  func.func @transform_0(%arg0: i32) -> (i32, i32) {
    %c0_i32 = arith.constant 0 : i32
    %c0_i32_0 = arith.constant 0 : i32
    return %arg0, %c0_i32 : i32, i32
  }
  func.func @transform_1(%arg0: i32) -> (i32, i32) {
    %c0_i32 = arith.constant 0 : i32
    %c0_i32_0 = arith.constant 0 : i32
    %c0_i32_1 = arith.constant 0 : i32
    return %c0_i32, %c0_i32_0 : i32, i32
  }
  func.func @transform_2(%arg0: i32) -> (i32, i32) {
    %c0_i32 = arith.constant 0 : i32
    %c0_i32_0 = arith.constant 0 : i32
    %c0_i32_1 = arith.constant 0 : i32
    return %c0_i32, %c0_i32_0 : i32, i32
  }
  func.func @transform_3(%arg0: i32) -> (i32, i32) {
    %c0_i32 = arith.constant 0 : i32
    %c0_i32_0 = arith.constant 0 : i32
    %c0_i32_1 = arith.constant 0 : i32
    return %c0_i32, %c0_i32_0 : i32, i32
  }
  func.func @transform_4(%arg0: i32) -> (i32, i32) {
    %c0_i32 = arith.constant 0 : i32
    %c0_i32_0 = arith.constant 0 : i32
    %c0_i32_1 = arith.constant 0 : i32
    return %c0_i32, %c0_i32_0 : i32, i32
  }
  func.func @transform_5(%arg0: i32) -> (i32, i32) {
    %c0_i32 = arith.constant 0 : i32
    %c0_i32_0 = arith.constant 0 : i32
    %c0_i32_1 = arith.constant 0 : i32
    return %c0_i32, %c0_i32_0 : i32, i32
  }
  func.func @transform_6(%arg0: i32) -> (i32, i32) {
    %c0_i32 = arith.constant 0 : i32
    %c0_i32_0 = arith.constant 0 : i32
    %c0_i32_1 = arith.constant 0 : i32
    return %c0_i32, %c0_i32_0 : i32, i32
  }
  func.func @transform_7(%arg0: i32) -> (i32, i32) {
    %c0_i32 = arith.constant 0 : i32
    %c0_i32_0 = arith.constant 0 : i32
    return %arg0, %c0_i32 : i32, i32
  }
}

</mosaic_0001>

<bundles_post_ra>
// kernel: tpu_custom_call.1
= control target key start
LH: loop header
LB: loop body
LE: loop exit
PB: predicated region body
PF: predicated region fallthrough
CT: control target
= control target key end

     0   :  { %s466_s0 = inlined_call_operand.hbm [shape: f32[16,16], index: 0, kind: input, shape index: {}]   ;;  %s467_s1 = inlined_call_operand.hbm [shape: f32[16,64], index: 1, kind: input, shape index: {}]   ;;  %s468_s2 = inlined_call_operand.vmem [shape: f32[1,64], index: 2, kind: input, shape index: {}]   ;;  %s469_s3 = inlined_call_operand.hbm [shape: f32[64,64], index: 3, kind: input, shape index: {}]   ;;  %s470_s4 = inlined_call_operand.vmem [shape: f32[1,64], index: 4, kind: input, shape index: {}]   ;;  %s471_s5 = inlined_call_operand.hbm [shape: f32[8,64], index: 5, kind: input, shape index: {}]   ;;  %s472_s6 = inlined_call_operand.<no memory space> [shape: f32[1,1], index: 6, kind: input, shape index: {}]   ;;  %s473_s7 = inlined_call_operand.hbm [shape: f32[1,16], index: 7, kind: output, shape index: {}]  }
   0x1   :  { %v12_v0 = vstv %s472_s6 }
   0x2   :  { %13 = vst [vmem:[#allocation2] sm:$0x1] %v12_v0 }
   0x3   :  { %14 = vsyncpa [#allocation4], 0 }
   0x4   :  { %15 = vsyncpa [#allocation7], 0 }
   0x5   :  { %16 = vsyncpa [#allocation10], 0 }
   0x6   :  { %17 = vsyncpa [#allocation5], 0  ;;  %s35_s28 = sshll.u32 %s467_s1, 4  ;;  %s387_s29 = smov [#allocation6]   ;;  %s36_s28 = int_to_ptr.hbm [resolvable:$true] %s35_s28 }
   0x7   :  { %s37_s30 = sshll.u32 %s387_s29, 4  ;;  %s22_s10 = sshll.u32 %s466_s0, 4  ;;  %s38_s30 = int_to_ptr.vmem [resolvable:$true] %s37_s30  ;;  %s23_s10 = int_to_ptr.hbm [resolvable:$true] %s22_s10 }
   0x8   :  { %s388_s11 = smov 128   ;;  %s389_s12 = smov 8  }
   0x9   :  { %43 = dma.hbm_to_vmem [thread:$0]  %s36_s28, 256, %s38_s30, [#allocation7], %s388_s11, %s388_s11, %s389_s12  }
   0xa   :  { %s390_s6 = smov [#allocation3]   ;;  %s50_s16 = sshll.u32 %s469_s3, 4  ;;  %s51_s16 = int_to_ptr.hbm [resolvable:$true] %s50_s16 }
   0xb   :  { %s24_s13 = sshll.u32 %s390_s6, 4  ;;  %s66_s18 = sshll.u32 %s471_s5, 4  ;;  %s25_s13 = int_to_ptr.vmem [resolvable:$true] %s24_s13  ;;  %s67_s18 = int_to_ptr.hbm [resolvable:$true] %s66_s18 }
   0xc   :  { %30 = dma.hbm_to_vmem [thread:$0]  %s23_s10, 256, %s25_s13, [#allocation4], %s388_s11, %s388_s11, %s389_s12  }
   0xd   :  { %s391_s19 = smov [#allocation8]   ;;  %s392_s0 = smov [#allocation9]  }
   0xe   :  { %s52_s20 = sshll.u32 %s391_s19, 4  ;;  %s68_s21 = sshll.u32 %s392_s0, 4  ;;  %s53_s20 = int_to_ptr.vmem [resolvable:$true] %s52_s20  ;;  %s69_s21 = int_to_ptr.vmem [resolvable:$true] %s68_s21 }
   0xf   :  { %58 = dma.hbm_to_vmem [thread:$0]  %s51_s16, 1024, %s53_s20, [#allocation7], %s388_s11, %s388_s11, %s389_s12  }
  0x10   :  { %71 = dma.hbm_to_vmem [thread:$0]  %s67_s18, 128, %s69_s21, [#allocation10]  }
  0x11   :  { %379 = dma.done.wait [#allocation4], 256  }
  0x12   :  { %380 = vsyncadd [#allocation4], 4294967040 }
  0x13   :  { %381 = dma.done.wait [#allocation7], 1280  }
  0x14   :  { %382 = vsyncadd [#allocation7], 4294966016 }
  0x15   :  { %383 = dma.done.wait [#allocation10], 128  }
  0x16   :  { %384 = vsyncadd [#allocation10], 4294967168  ;;  %v93_v1 = vld [vmem:[#allocation6 + $0x8] sm:$0xff]  ;;  %v92_v2 = vld [vmem:[#allocation6] sm:$0xff]  ;;  %vm98_vm0 = vcmask 130048   ;;  %vm142_vm1 = vcmask 523264  }
  0x17   :  { %119 = vmatpush.msra.mxu0 %v93_v1  ;;  %v90_v3 = vld [vmem:[#allocation3] sm:$0xff]  ;;  %v137_v4 = vld [vmem:[#allocation8 + $0x38] sm:$0xff]  ;;  %v136_v5 = vld [vmem:[#allocation8 + $0x30] sm:$0xff]  ;;  %v393_v21 = vmov 0   ;;  %vm212_vm2 = vcmask 122880  }
  0x18   :  { %157 = vmatpush.msra.mxu1 %v137_v4  ;;  %240 = vmatpush.msra.mxu3 %v137_v4  ;;  %v135_v6 = vld [vmem:[#allocation8 + $0x28] sm:$0xff]  ;;  %v134_v7 = vld [vmem:[#allocation8 + $0x20] sm:$0xff]  ;;  %v133_v8 = vld [vmem:[#allocation8 + $0x18] sm:$0xff] }
  0x19   :  { %120 = vmatpush.msra.mxu0 %v92_v2  ;;  %v91_v9 = vld [vmem:[#allocation3 + $0x8] sm:$0xff]  ;;  %v132_v10 = vld [vmem:[#allocation8 + $0x10] sm:$0xff]  ;;  %v130_v12 = vld [vmem:[#allocation8] sm:$0xff]  ;;  %256 = vset.pattern.permute.xlu0 %v393_v21 }
  0x1a   :  { %233 = vmatmul.msk.f32.vlgmr.msra.gmra.mxu0 %vm98_vm0, %v90_v3  ;;  %158 = vmatpush.msra.mxu1 %v136_v5  ;;  %v131_v11 = vld [vmem:[#allocation8 + $0x8] sm:$0xff]  ;;  %v257_v13 = vld [vmem:[%s468_s2] ss:$0 sm:$0xff]  ;;  %v174_v29 = vld [vmem:[#allocation9] sm:$0xff]  ;;  %s394_s2 = smov [#allocation11]  }
  0x1b   :  { %241 = vmatpush.msra.mxu3 %v136_v5  ;;  %v204_v20 = vld [vmem:[#allocation2] sm:$0x1]  ;;  %s219_s24 = sshll.u32 %s394_s2, 4  ;;  %s220_s24 = int_to_ptr.vmem [resolvable:$true] %s219_s24 }
  0x1c   :  { %159 = vmatpush.msra.mxu1 %v135_v6  ;;  %207 = vperm.xlu0 %256, %v204_v20   ;;  %v258_v22 = vld [vmem:[%s470_s4] ss:$0 sm:$0xff]  ;;  %s221_s4 = sshll.u32 %s473_s7, 4  ;;  %s222_s4 = int_to_ptr.hbm [resolvable:$true] %s221_s4 }
  0x1d   :  { %242 = vmatpush.msra.mxu3 %v135_v6 }
  0x1e   :  { %160 = vmatpush.msra.mxu1 %v134_v7 }
  0x1f   :  { %243 = vmatpush.msra.mxu3 %v134_v7 }
  0x20   :  { %161 = vmatpush.msra.mxu1 %v133_v8 }
  0x21   :  { %244 = vmatpush.msra.mxu3 %v133_v8 }
  0x22   :  { %234 = vmatmul.msk.f32.gmra.mxu0 %vm98_vm0, %v91_v9  ;;  %162 = vmatpush.msra.mxu1 %v132_v10 }
  0x23   :  { %245 = vmatpush.msra.mxu3 %v132_v10 }
  0x24   :  { %163 = vmatpush.msra.mxu1 %v131_v11 }
  0x25   :  { %246 = vmatpush.msra.mxu3 %v131_v11 }
  0x26   :  { %164 = vmatpush.msra.mxu1 %v130_v12 }
  0x27   :  { %247 = vmatpush.msra.mxu3 %v130_v12 }
  0x8e   :  { %v208_v30 = vpop.permute.xlu0 %207 }
  0x8f   :  { %v210_v31 = vperm.slane %v208_v30, 0 }
  0x97   :  { %v122_v14 = vpop.f32.mrf.mxu0 }
  0x98   :  { %v123_v15 = vadd.f32 %v257_v13, %v122_v14 }
  0x9a   :  { %v128_v16 = vmax.f32 %v123_v15, 0.0 }
  0x9c   :  { %235 = vmatmul.msk.f32.vlgmr.msra.gmra.mxu1 %vm142_vm1, %v128_v16 }
  0x9f   :  { %v125_v17 = vpop.f32.mrf.mxu0 }
  0xa0   :  { %v126_v18 = vadd.f32 %v257_v13, %v125_v17 }
  0xa2   :  { %v129_v19 = vmax.f32 %v126_v18, 0.0 }
  0xa4   :  { %236 = vmatmul.msk.f32.vlgmr.msra.gmra.mxu3 %vm142_vm1, %v129_v19 }
 0x119   :  { %v166_v23 = vpop.f32.mrf.mxu1 }
 0x11a   :  { %v167_v26 = vadd.f32 %v258_v22, %v166_v23 }
 0x11c   :  { %v172_v28 = vmax.f32 %v167_v26, 0.0 }
 0x127   :  { %v169_v24 = vpop.f32.mrf.mxu3 }
 0x128   :  { %v170_v25 = vadd.f32 %v258_v22, %v169_v24 }
 0x12a   :  { %v173_v27 = vmax.f32 %v170_v25, 0.0 }
 0x12c   :  { %237 = vmatpush.xpose.msk.msra.mxu2 %vm142_vm1, %v173_v27 }
 0x130   :  { %238 = vmatpush.xpose.msk.msra.mxu2 %vm142_vm1, %v172_v28 }
 0x133   :  { %239 = vmatmul.msk.f32.vlgmr.msra.gmra.mxu2 %vm142_vm1, %v174_v29 }
 0x1b6   :  { %v201_v32 = vpop.f32.mrf.mxu2 }
 0x1b7   :  { %v211_v33 = vadd.f32 %v210_v31, %v201_v32 }
 0x1b9   :  { %213 = vst.msk [vmem:[#allocation11] sm:$0x1] %vm212_vm2, %v211_v33 }
 0x1ba   :  { %224 = dma.vmem_to_hbm [thread:$0]  %s220_s24, 16, %s222_s4, [#allocation5]  }
 0x1bb   :  { %385 = dma.done.wait [#allocation5], 16  }
 0x1bc   :  { %386 = vsyncadd [#allocation5], 4294967280 }
 0x1bd   :  { %229 = vsyncpa [#allocation4], 1 }
 0x1be   :  { %230 = vsyncpa [#allocation7], 1 }
 0x1bf   :  { %231 = vsyncpa [#allocation10], 1 }
 0x1c0   :  { %232 = vsyncpa [#allocation5], 1 }

</bundles_post_ra>
